<compile_context>
chip_gen: v5e
topology: v5e:2x2
jax: 0.10.0
libtpu: 0.0.40
codegen_flags: <defaults>
</compile_context>

<pallas_src>
import jax
import jax.numpy as jnp
from jax.experimental import pallas as pl
from jax.experimental.pallas import tpu as pltpu

BN_EPS = 1e-5


def _round_up(v, m):
    return ((v + m - 1) // m) * m


def _linear_bn_kernel(x_ref, w_ref, s_ref, o_ref):
    """One row tile of  y = (x @ W) * scale + shift  (Linear + folded BatchNorm).

    x_ref : (TM, K) bf16   row tile of raw features
    w_ref : (K, H)  bf16   weights (resident across the whole grid)
    s_ref : (2, H)  f32    row 0 = scale = gamma * rsqrt(var + eps)
                           row 1 = shift = beta - mean_h * scale
    o_ref : (TM, H)        normalized output tile
    """
    h = jnp.dot(x_ref[...], w_ref[...], preferred_element_type=jnp.float32)
    scale = s_ref[0:1, :]
    shift = s_ref[1:2, :]
    o_ref[...] = (h * scale + shift).astype(o_ref.dtype)


def _linear_bn_path(x, w, gamma, beta, *, out_dtype=jnp.float32,
                    max_tile_rows=8192, vmem_budget_bytes=12 * 1024 * 1024):
    """Linear(x) -> BatchNorm1d (training-mode batch stats), one HBM pass."""
    n, k = x.shape
    h = w.shape[1]

    # bf16 inputs/weights: native single-pass MXU format, halves input DMA.
    x_q = x.astype(jnp.bfloat16)
    w_q = w.astype(jnp.bfloat16)

    # ---- BatchNorm statistics from x-moments (O(K^2 + K*H), K is tiny). ----
    # Computed on the same bf16-quantized operands the kernel consumes so the
    # folded affine matches the in-kernel matmul.  The Linear bias cancels
    # inside (h - mean(h)) and therefore never enters the kernel.
    xf = x_q.astype(jnp.float32)
    wf = w_q.astype(jnp.float32)
    mean_x = jnp.mean(xf, axis=0)                              # (K,)
    xc = xf - mean_x[None, :]
    cov_x = (xc.T @ xc) / jnp.float32(n)                       # (K, K), biased (PyTorch BN)
    mean_h = mean_x @ wf                                       # (H,)
    var_h = jnp.maximum(jnp.sum((cov_x @ wf) * wf, axis=0), 0.0)
    scale = gamma.astype(jnp.float32) * jax.lax.rsqrt(var_h + BN_EPS)
    shift = beta.astype(jnp.float32) - mean_h * scale
    scales = jnp.stack([scale, shift])                         # (2, H) f32

    # ---- Row tiling (rows padded to a multiple of 8 only when needed). ----
    n_pad = _round_up(n, 8)
    if n_pad != n:
        x_q = jnp.pad(x_q, ((0, n_pad - n), (0, 0)))

    out_itemsize = jnp.dtype(out_dtype).itemsize
    per_row_bytes = 2 * (h * out_itemsize + k * 2)              # double-buffered out + in tiles
    tm = vmem_budget_bytes // per_row_bytes
    tm = min(tm, max_tile_rows, n_pad)
    tm = max(8, (tm // 8) * 8)
    grid = (pl.cdiv(n_pad, tm),)                                # ragged last block is masked by Pallas

    out = pl.pallas_call(
        _linear_bn_kernel,
        out_shape=jax.ShapeDtypeStruct((n_pad, h), out_dtype),
        grid_spec=pltpu.PrefetchScalarGridSpec(
            num_scalar_prefetch=0,
            grid=grid,
            in_specs=[
                pl.BlockSpec((tm, k), lambda r: (r, 0)),        # x row tile
                pl.BlockSpec((k, h), lambda r: (0, 0)),         # weights, resident
                pl.BlockSpec((2, h), lambda r: (0, 0)),         # [scale; shift]
            ],
            out_specs=pl.BlockSpec((tm, h), lambda r: (r, 0)),
        ),
        compiler_params=pltpu.CompilerParams(
            # Row tiles are fully independent -> megacore-shard them (v7x).
            dimension_semantics=("parallel",),
            vmem_limit_bytes=32 * 1024 * 1024,
        ),
    )(x_q, w_q, scales)

    return out[:n] if n_pad != n else out


def feature_encoder_forward(params, x, edge_attr, *, out_dtype=jnp.float32):
    """FeatureEncoder.forward: node Linear+BN on x, edge Linear+BN on edge_attr.

    Each path is a single, exactly-sized, row-parallel pallas_call.
    Returns (x_out [N_nodes, dim_inner], e_out [N_edges, dim_edge]).
    """
    x_out = _linear_bn_path(x, params.node_w, params.node_gamma, params.node_beta,
                            out_dtype=out_dtype)
    e_out = _linear_bn_path(edge_attr, params.edge_w, params.edge_gamma, params.edge_beta,
                            out_dtype=out_dtype)
    # Note: the Linear biases (params.node_b / params.edge_b) cancel exactly
    # inside the batch normalization and therefore never reach the kernel.
    # TODO(synk): ExpanderEdgeFixer (Exphormer expander-graph edge construction)
    # is edge_index data-structure manipulation, not a tensor hot path.
    # TODO(synk): PyTorch training-mode BatchNorm1d also updates
    # running_mean/running_var (unbiased); only batch-stat normalization is done here.
    return x_out, e_out


class FeatureEncoderParams:
    """Deterministic parameter container mirroring FeatureEncoder.__init__ shapes."""

    def __init__(self, key, node_dim_in, edge_dim_in, dim_inner, dim_edge):
        kn_w, kn_b, ke_w, ke_b = jax.random.split(key, 4)
        # node_encoder: Linear(node_dim_in, dim_inner)
        self.node_w = jax.random.normal(kn_w, (node_dim_in, dim_inner), jnp.float32) * 0.1
        self.node_b = jax.random.normal(kn_b, (dim_inner,), jnp.float32) * 0.1
        # node_encoder_bn: BatchNorm1d(dim_inner) affine params
        self.node_gamma = jnp.ones((dim_inner,), jnp.float32)
        self.node_beta = jnp.zeros((dim_inner,), jnp.float32)
        # edge_encoder: Linear(edge_dim_in, dim_edge)
        self.edge_w = jax.random.normal(ke_w, (edge_dim_in, dim_edge), jnp.float32) * 0.1
        self.edge_b = jax.random.normal(ke_b, (dim_edge,), jnp.float32) * 0.1
        # edge_encoder_bn: BatchNorm1d(dim_edge) affine params
        self.edge_gamma = jnp.ones((dim_edge,), jnp.float32)
        self.edge_beta = jnp.zeros((dim_edge,), jnp.float32)


def _reference_linear_bn(x, w, b, gamma, beta):
    """Pure-JAX reference (same bf16 quantization of x and W as the kernel)."""
    xf = x.astype(jnp.bfloat16).astype(jnp.float32)
    wf = w.astype(jnp.bfloat16).astype(jnp.float32)
    h = xf @ wf + b[None, :]
    mean = jnp.mean(h, axis=0, keepdims=True)
    var = jnp.mean((h - mean) ** 2, axis=0, keepdims=True)
    return gamma[None, :] * (h - mean) / jnp.sqrt(var + BN_EPS) + beta[None, :]


if __name__ == "__main__":
    key = jax.random.PRNGKey(0)
    k_params, k_x, k_e = jax.random.split(key, 3)

    # Small shapes: 16 nodes with 4-dim raw features, 24 edges with 4-dim raw
    # features, encoded to dim_inner = dim_edge = 32.
    N_NODES, NODE_DIM_IN = 16, 4
    N_EDGES, EDGE_DIM_IN = 24, 4
    DIM_INNER, DIM_EDGE = 32, 32

    params = FeatureEncoderParams(k_params, NODE_DIM_IN, EDGE_DIM_IN,
                                  DIM_INNER, DIM_EDGE)
    x = jax.random.normal(k_x, (N_NODES, NODE_DIM_IN), jnp.float32)
    edge_attr = jax.random.normal(k_e, (N_EDGES, EDGE_DIM_IN), jnp.float32)

    x_out, e_out = feature_encoder_forward(params, x, edge_attr)
    jax.block_until_ready((x_out, e_out))

    # Shape checks.
    assert x_out.shape == (N_NODES, DIM_INNER)
    assert e_out.shape == (N_EDGES, DIM_EDGE)

    # BatchNorm sanity: per-feature mean of the normalized output ~ 0.
    assert jnp.max(jnp.abs(jnp.mean(x_out, axis=0))) < 1e-4
    assert jnp.max(jnp.abs(jnp.mean(e_out, axis=0))) < 1e-4

    # Numerical parity with a pure-JAX reference (same bf16 quantization).
    x_ref = _reference_linear_bn(x, params.node_w, params.node_b,
                                 params.node_gamma, params.node_beta)
    e_ref = _reference_linear_bn(edge_attr, params.edge_w, params.edge_b,
                                 params.edge_gamma, params.edge_beta)
    assert jnp.allclose(x_out, x_ref, atol=1e-3, rtol=1e-3)
    assert jnp.allclose(e_out, e_ref, atol=1e-3, rtol=1e-3)

    print("KERNEL_OK")
</pallas_src>

<mosaic_0001>
module attributes {stable_mosaic.version = 11 : i64} {
  func.func @_linear_bn_kernel(%arg0: i32, %arg1: memref<16x4xbf16, #tpu.memory_space<vmem>>, %arg2: memref<4x32xbf16, #tpu.memory_space<vmem>>, %arg3: memref<2x32xf32, #tpu.memory_space<vmem>>, %arg4: memref<16x32xf32, #tpu.memory_space<vmem>>) attributes {dimension_semantics = [#tpu.dimension_semantics<parallel>], iteration_bounds = array<i64: 1>, scalar_prefetch = 0 : i64, scratch_operands = 0 : i64, tpu.core_type = #tpu.core_type<tc>, window_params = [{transform_indices = @transform_0, window_bounds = array<i64: 16, 4>}, {pipeline_mode = #tpu.pipeline_mode<synchronous>, transform_indices = @transform_1, window_bounds = array<i64: 4, 32>}, {pipeline_mode = #tpu.pipeline_mode<synchronous>, transform_indices = @transform_2, window_bounds = array<i64: 2, 32>}, {transform_indices = @transform_3, window_bounds = array<i64: 16, 32>}]} {
    %c0 = arith.constant 0 : index
    %c0_0 = arith.constant 0 : index
    %0 = vector.load %arg1[%c0, %c0_0] : memref<16x4xbf16, #tpu.memory_space<vmem>>, vector<16x4xbf16>
    %c0_1 = arith.constant 0 : index
    %c0_2 = arith.constant 0 : index
    %1 = vector.load %arg2[%c0_1, %c0_2] : memref<4x32xbf16, #tpu.memory_space<vmem>>, vector<4x32xbf16>
    %cst = arith.constant dense<0.000000e+00> : vector<16x32xf32>
    %2 = tpu.matmul %0, %1, %cst {dimension_numbers = #tpu.dot_dimension_numbers<[1], [0], [0], [1], [0, 0, 1, 1], [], []>} : vector<16x4xbf16>, vector<4x32xbf16>, vector<16x32xf32> -> vector<16x32xf32>
    %c0_3 = arith.constant 0 : index
    %c0_4 = arith.constant 0 : index
    %3 = vector.load %arg3[%c0_3, %c0_4] : memref<2x32xf32, #tpu.memory_space<vmem>>, vector<1x32xf32>
    %c1 = arith.constant 1 : index
    %c0_5 = arith.constant 0 : index
    %4 = vector.load %arg3[%c1, %c0_5] : memref<2x32xf32, #tpu.memory_space<vmem>>, vector<1x32xf32>
    %5 = vector.broadcast %3 : vector<1x32xf32> to vector<16x32xf32>
    %6 = arith.mulf %2, %5 : vector<16x32xf32>
    %7 = vector.broadcast %4 : vector<1x32xf32> to vector<16x32xf32>
    %8 = arith.addf %6, %7 : vector<16x32xf32>
    %c0_6 = arith.constant 0 : index
    %c0_7 = arith.constant 0 : index
    %9 = vector.load %arg4[%c0_6, %c0_7] : memref<16x32xf32, #tpu.memory_space<vmem>>, vector<16x32xf32>
    tpu.vector_store %arg4[%c0_6, %c0_7], %8 {strides = array<i32>} : memref<16x32xf32, #tpu.memory_space<vmem>>, vector<16x32xf32>,
    return
  }
  func.func @transform_0(%arg0: i32) -> (i32, i32) {
    %c0_i32 = arith.constant 0 : i32
    %c0_i32_0 = arith.constant 0 : i32
    return %arg0, %c0_i32 : i32, i32
  }
  func.func @transform_1(%arg0: i32) -> (i32, i32) {
    %c0_i32 = arith.constant 0 : i32
    %c0_i32_0 = arith.constant 0 : i32
    %c0_i32_1 = arith.constant 0 : i32
    return %c0_i32, %c0_i32_0 : i32, i32
  }
  func.func @transform_2(%arg0: i32) -> (i32, i32) {
    %c0_i32 = arith.constant 0 : i32
    %c0_i32_0 = arith.constant 0 : i32
    %c0_i32_1 = arith.constant 0 : i32
    return %c0_i32, %c0_i32_0 : i32, i32
  }
  func.func @transform_3(%arg0: i32) -> (i32, i32) {
    %c0_i32 = arith.constant 0 : i32
    %c0_i32_0 = arith.constant 0 : i32
    return %arg0, %c0_i32 : i32, i32
  }
}

</mosaic_0001>

<bundles_post_ra>
// kernel: tpu_custom_call.1
= control target key start
LH: loop header
LB: loop body
LE: loop exit
PB: predicated region body
PF: predicated region fallthrough
CT: control target
= control target key end

     0   :  { %vm28_vm0 = vcmask 1041408   ;;  %vm24_vm1 = vcmask 31744   ;;  %s150_s0 = inlined_call_operand.vmem [shape: bf16[16,4], index: 0, kind: input, shape index: {}]   ;;  %s151_s1 = inlined_call_operand.vmem [shape: bf16[4,32], index: 1, kind: input, shape index: {}]   ;;  %s152_s2 = inlined_call_operand.vmem [shape: f32[2,32], index: 2, kind: input, shape index: {}]   ;;  %s153_s3 = inlined_call_operand.hbm [shape: f32[16,32], index: 3, kind: output, shape index: {}]  }
   0x1   :  { %v18_v0 = vld [vmem:[%s151_s1] sm:$0x3] }
   0x2   :  { %v30_v1 = vsel %vm28_vm0, %v18_v0, 0  ;;  %v80_v2 = vld [vmem:[%s150_s0] sm:$0xff] }
   0x3   :  { %39 = vmatpush.bf16.msra.mxu0 %v30_v1 }
   0x4   :  { %8 = vsyncpa [#allocation3], 0  ;;  %v84_v3 = vld [vmem:[%s152_s2] ss:$0 sm:$0xff]  ;;  %v85_v4 = vld [vmem:[%s152_s2 + $0x1] ss:$0 sm:$0xff] }
   0x5   :  { %vm54_vm2 = vcmask 261120   ;;  %s112_s1 = smov [#allocation2]   ;;  %s63_s22 = sshll.u32 %s153_s3, 4  ;;  %s64_s22 = int_to_ptr.hbm [resolvable:$true] %s63_s22 }
   0x6   :  { %79 = vmatmul.msk.bf16.vlgmr.msra.gmra.mxu0 %vm24_vm1, %v80_v2  ;;  %s61_s20 = sshll.u32 %s112_s1, 4  ;;  %s113_s23 = smov 128   ;;  %s62_s20 = int_to_ptr.vmem [resolvable:$true] %s61_s20 }
   0x7   :  { %s114_s24 = smov 8  }
  0x83   :  { %v41_v5 = vpop.f32.mrf.mxu0 }
  0x84   :  { %v49_v6 = vmul.f32 %v84_v3, %v41_v5 }
  0x86   :  { %v52_v7 = vadd.f32 %v85_v4, %v49_v6 }
  0x88   :  { %55 = vst.msk [vmem:[#allocation2] sm:$0xff] %vm54_vm2, %v52_v7 }
  0x8b   :  { %v43_v8 = vpop.f32.mrf.mxu0 }
  0x8c   :  { %v50_v9 = vmul.f32 %v84_v3, %v43_v8 }
  0x8e   :  { %v53_v10 = vadd.f32 %v85_v4, %v50_v9 }
  0x90   :  { %56 = vst.msk [vmem:[#allocation2 + $0x8] sm:$0xff] %vm54_vm2, %v53_v10 }
  0x91   :  { %69 = dma.vmem_to_hbm [thread:$0]  %s62_s20, 256, %s64_s22, [#allocation3], %s113_s23, %s113_s23, %s114_s24  }
  0x92   :  { %110 = dma.done.wait [#allocation3], 256  }
  0x93   :  { %111 = vsyncadd [#allocation3], 4294967040 }
  0x94   :  { %74 = vsyncpa [#allocation3], 1 }

</bundles_post_ra>
